<compile_context>
chip_gen: v6e
topology: v6e:2x2x1
jax: 0.10.0
libtpu: 0.0.40
codegen_flags: <defaults>
</compile_context>

<pallas_src>
import jax
import jax.numpy as jnp
from jax.experimental import pallas as pl
from jax.experimental.pallas import tpu as pltpu


def _outconv_kernel(w_ref, b_ref, x_ref, o_ref):
    # w_ref: SMEM (C_out, C_in) f32 scalars
    # b_ref: SMEM (C_out,)      f32 scalars
    # x_ref: VMEM (1, C_in,  TP)   -- TP = pixel tile (lane axis)
    # o_ref: VMEM (1, C_out, TP)
    c_out, c_in = w_ref.shape
    # Load each input-channel row once (lane-dense (1, TP) vregs), reuse C_out times.
    rows = [x_ref[0, ci:ci + 1, :].astype(jnp.float32) for ci in range(c_in)]
    for co in range(c_out):
        # bias folds into the first FMA
        acc = rows[0] * w_ref[co, 0] + b_ref[co]
        for ci in range(1, c_in):
            acc = acc + rows[ci] * w_ref[co, ci]
        o_ref[0, co:co + 1, :] = acc.astype(o_ref.dtype)


def _pick_tile_px(hw, max_tile=4096):
    # Largest lane-dense tile that divides HW exactly (no pad / no ragged tile).
    for t in (max_tile, 2048, 1024, 512, 256, 128):
        if t <= hw and hw % t == 0:
            return t
    # Fall back to the full extent (exempt from the 128-lane divisibility rule).
    return hw


def outconv_forward(x_nchw, weight, bias, *, max_tile_px=4096):
    """1x1 conv forward.

    x_nchw: (N, C_in, H, W)   float32
    weight: (C_out, C_in)     float32  (squeezed from (C_out, C_in, 1, 1))
    bias:   (C_out,)          float32
    returns (N, C_out, H, W)  float32
    """
    N, C_in, H, W = x_nchw.shape
    C_out = weight.shape[0]
    HW = H * W

    # Contiguous reshape only (no transpose, no extra HBM pass).
    x_flat = x_nchw.reshape(N, C_in, HW)

    tile_px = _pick_tile_px(HW, max_tile_px)
    grid = (N, HW // tile_px)

    cost = pl.CostEstimate(
        flops=2 * N * HW * C_in * C_out,
        transcendentals=0,
        bytes_accessed=4 * N * HW * (C_in + C_out) + 4 * (C_out * C_in + C_out),
    )

    out_flat = pl.pallas_call(
        _outconv_kernel,
        out_shape=jax.ShapeDtypeStruct((N, C_out, HW), x_nchw.dtype),
        grid_spec=pltpu.PrefetchScalarGridSpec(
            num_scalar_prefetch=0,
            grid=grid,
            in_specs=[
                # Tiny grid-invariant parameters -> SMEM scalars.
                pl.BlockSpec(memory_space=pltpu.MemorySpace.SMEM),  # weight (C_out, C_in)
                pl.BlockSpec(memory_space=pltpu.MemorySpace.SMEM),  # bias   (C_out,)
                # Activations: pixel tile on the lane axis, full channel extent.
                pl.BlockSpec((1, C_in, tile_px), lambda n, p: (n, 0, p)),
            ],
            out_specs=pl.BlockSpec((1, C_out, tile_px), lambda n, p: (n, 0, p)),
        ),
        compiler_params=pltpu.CompilerParams(
            dimension_semantics=("parallel", "parallel")),
        cost_estimate=cost,
    )(weight, bias, x_flat)

    # Contiguous reshape back to NCHW (free).
    return out_flat.reshape(N, C_out, H, W)


def outconv_reference(x_nchw, weight, bias):
    # Pure-JAX reference: einsum over channel dim + bias.
    out = jnp.einsum("nchw,oc->nohw", x_nchw, weight)
    return out + bias[None, :, None, None]


if __name__ == "__main__":
    key = jax.random.PRNGKey(0)
    k_x, k_w, k_b = jax.random.split(key, 3)

    # Small shapes consistent with outconv(in_ch=4, out_ch=3)
    N, C_in, H, W = 2, 4, 16, 16
    C_out = 3

    x = jax.random.normal(k_x, (N, C_in, H, W), dtype=jnp.float32)
    # Deterministic parameter init (mimics Conv2d param shapes, squeezed 1x1 kernel).
    weight = jax.random.normal(k_w, (C_out, C_in), dtype=jnp.float32) * 0.1
    bias = jax.random.normal(k_b, (C_out,), dtype=jnp.float32) * 0.1

    out = outconv_forward(x, weight, bias)
    out = jax.block_until_ready(out)

    ref = outconv_reference(x, weight, bias)
    assert out.shape == (N, C_out, H, W), out.shape
    assert jnp.allclose(out, ref, atol=1e-5, rtol=1e-5), "mismatch vs reference"

    print("KERNEL_OK")
</pallas_src>

<mosaic_0001>
module attributes {stable_mosaic.version = 11 : i64} {
  func.func @_outconv_kernel(%arg0: i32, %arg1: i32, %arg2: memref<3x4xf32, #tpu.memory_space<smem>>, %arg3: memref<3xf32, #tpu.memory_space<smem>>, %arg4: memref<1x4x256xf32, #tpu.memory_space<vmem>>, %arg5: memref<1x3x256xf32, #tpu.memory_space<vmem>>) attributes {dimension_semantics = [#tpu.dimension_semantics<parallel>, #tpu.dimension_semantics<parallel>], iteration_bounds = array<i64: 2, 1>, scalar_prefetch = 0 : i64, scratch_operands = 0 : i64, tpu.core_type = #tpu.core_type<tc>, window_params = [{transform_indices = @transform_0, window_bounds = array<i64: 3, 4>}, {transform_indices = @transform_1, window_bounds = array<i64: 3>}, {transform_indices = @transform_2, window_bounds = array<i64: 1, 4, 256>}, {transform_indices = @transform_3, window_bounds = array<i64: 1, 3, 256>}]} {
    %c0 = arith.constant 0 : index
    %c0_0 = arith.constant 0 : index
    %c0_1 = arith.constant 0 : index
    %0 = vector.load %arg4[%c0, %c0_0, %c0_1] : memref<1x4x256xf32, #tpu.memory_space<vmem>>, vector<1x1x256xf32>
    %1 = vector.shape_cast %0 : vector<1x1x256xf32> to vector<1x256xf32>
    %c0_2 = arith.constant 0 : index
    %c1 = arith.constant 1 : index
    %c0_3 = arith.constant 0 : index
    %2 = vector.load %arg4[%c0_2, %c1, %c0_3] : memref<1x4x256xf32, #tpu.memory_space<vmem>>, vector<1x1x256xf32>
    %3 = vector.shape_cast %2 : vector<1x1x256xf32> to vector<1x256xf32>
    %c0_4 = arith.constant 0 : index
    %c2 = arith.constant 2 : index
    %c0_5 = arith.constant 0 : index
    %4 = vector.load %arg4[%c0_4, %c2, %c0_5] : memref<1x4x256xf32, #tpu.memory_space<vmem>>, vector<1x1x256xf32>
    %5 = vector.shape_cast %4 : vector<1x1x256xf32> to vector<1x256xf32>
    %c0_6 = arith.constant 0 : index
    %c3 = arith.constant 3 : index
    %c0_7 = arith.constant 0 : index
    %6 = vector.load %arg4[%c0_6, %c3, %c0_7] : memref<1x4x256xf32, #tpu.memory_space<vmem>>, vector<1x1x256xf32>
    %7 = vector.shape_cast %6 : vector<1x1x256xf32> to vector<1x256xf32>
    %c0_8 = arith.constant 0 : index
    %c0_9 = arith.constant 0 : index
    %8 = memref.load %arg2[%c0_8, %c0_9] : memref<3x4xf32, #tpu.memory_space<smem>>
    %9 = vector.broadcast %8 : f32 to vector<1x256xf32>
    %10 = arith.mulf %1, %9 : vector<1x256xf32>
    %c0_10 = arith.constant 0 : index
    %11 = memref.load %arg3[%c0_10] : memref<3xf32, #tpu.memory_space<smem>>
    %12 = vector.broadcast %11 : f32 to vector<1x256xf32>
    %13 = arith.addf %10, %12 : vector<1x256xf32>
    %c0_11 = arith.constant 0 : index
    %c1_12 = arith.constant 1 : index
    %14 = memref.load %arg2[%c0_11, %c1_12] : memref<3x4xf32, #tpu.memory_space<smem>>
    %15 = vector.broadcast %14 : f32 to vector<1x256xf32>
    %16 = arith.mulf %3, %15 : vector<1x256xf32>
    %17 = arith.addf %13, %16 : vector<1x256xf32>
    %c0_13 = arith.constant 0 : index
    %c2_14 = arith.constant 2 : index
    %18 = memref.load %arg2[%c0_13, %c2_14] : memref<3x4xf32, #tpu.memory_space<smem>>
    %19 = vector.broadcast %18 : f32 to vector<1x256xf32>
    %20 = arith.mulf %5, %19 : vector<1x256xf32>
    %21 = arith.addf %17, %20 : vector<1x256xf32>
    %c0_15 = arith.constant 0 : index
    %c3_16 = arith.constant 3 : index
    %22 = memref.load %arg2[%c0_15, %c3_16] : memref<3x4xf32, #tpu.memory_space<smem>>
    %23 = vector.broadcast %22 : f32 to vector<1x256xf32>
    %24 = arith.mulf %7, %23 : vector<1x256xf32>
    %25 = arith.addf %21, %24 : vector<1x256xf32>
    %c0_17 = arith.constant 0 : index
    %c0_18 = arith.constant 0 : index
    %c0_19 = arith.constant 0 : index
    %26 = vector.load %arg5[%c0_17, %c0_18, %c0_19] : memref<1x3x256xf32, #tpu.memory_space<vmem>>, vector<1x1x256xf32>
    %27 = vector.shape_cast %26 : vector<1x1x256xf32> to vector<1x256xf32>
    %28 = vector.shape_cast %25 : vector<1x256xf32> to vector<1x1x256xf32>
    tpu.vector_store %arg5[%c0_17, %c0_18, %c0_19], %28 {strides = array<i32>} : memref<1x3x256xf32, #tpu.memory_space<vmem>>, vector<1x1x256xf32>,
    %c1_20 = arith.constant 1 : index
    %c0_21 = arith.constant 0 : index
    %29 = memref.load %arg2[%c1_20, %c0_21] : memref<3x4xf32, #tpu.memory_space<smem>>
    %30 = vector.broadcast %29 : f32 to vector<1x256xf32>
    %31 = arith.mulf %1, %30 : vector<1x256xf32>
    %c1_22 = arith.constant 1 : index
    %32 = memref.load %arg3[%c1_22] : memref<3xf32, #tpu.memory_space<smem>>
    %33 = vector.broadcast %32 : f32 to vector<1x256xf32>
    %34 = arith.addf %31, %33 : vector<1x256xf32>
    %c1_23 = arith.constant 1 : index
    %c1_24 = arith.constant 1 : index
    %35 = memref.load %arg2[%c1_23, %c1_24] : memref<3x4xf32, #tpu.memory_space<smem>>
    %36 = vector.broadcast %35 : f32 to vector<1x256xf32>
    %37 = arith.mulf %3, %36 : vector<1x256xf32>
    %38 = arith.addf %34, %37 : vector<1x256xf32>
    %c1_25 = arith.constant 1 : index
    %c2_26 = arith.constant 2 : index
    %39 = memref.load %arg2[%c1_25, %c2_26] : memref<3x4xf32, #tpu.memory_space<smem>>
    %40 = vector.broadcast %39 : f32 to vector<1x256xf32>
    %41 = arith.mulf %5, %40 : vector<1x256xf32>
    %42 = arith.addf %38, %41 : vector<1x256xf32>
    %c1_27 = arith.constant 1 : index
    %c3_28 = arith.constant 3 : index
    %43 = memref.load %arg2[%c1_27, %c3_28] : memref<3x4xf32, #tpu.memory_space<smem>>
    %44 = vector.broadcast %43 : f32 to vector<1x256xf32>
    %45 = arith.mulf %7, %44 : vector<1x256xf32>
    %46 = arith.addf %42, %45 : vector<1x256xf32>
    %c0_29 = arith.constant 0 : index
    %c1_30 = arith.constant 1 : index
    %c0_31 = arith.constant 0 : index
    %47 = vector.load %arg5[%c0_29, %c1_30, %c0_31] : memref<1x3x256xf32, #tpu.memory_space<vmem>>, vector<1x1x256xf32>
    %48 = vector.shape_cast %47 : vector<1x1x256xf32> to vector<1x256xf32>
    %49 = vector.shape_cast %46 : vector<1x256xf32> to vector<1x1x256xf32>
    tpu.vector_store %arg5[%c0_29, %c1_30, %c0_31], %49 {strides = array<i32>} : memref<1x3x256xf32, #tpu.memory_space<vmem>>, vector<1x1x256xf32>,
    %c2_32 = arith.constant 2 : index
    %c0_33 = arith.constant 0 : index
    %50 = memref.load %arg2[%c2_32, %c0_33] : memref<3x4xf32, #tpu.memory_space<smem>>
    %51 = vector.broadcast %50 : f32 to vector<1x256xf32>
    %52 = arith.mulf %1, %51 : vector<1x256xf32>
    %c2_34 = arith.constant 2 : index
    %53 = memref.load %arg3[%c2_34] : memref<3xf32, #tpu.memory_space<smem>>
    %54 = vector.broadcast %53 : f32 to vector<1x256xf32>
    %55 = arith.addf %52, %54 : vector<1x256xf32>
    %c2_35 = arith.constant 2 : index
    %c1_36 = arith.constant 1 : index
    %56 = memref.load %arg2[%c2_35, %c1_36] : memref<3x4xf32, #tpu.memory_space<smem>>
    %57 = vector.broadcast %56 : f32 to vector<1x256xf32>
    %58 = arith.mulf %3, %57 : vector<1x256xf32>
    %59 = arith.addf %55, %58 : vector<1x256xf32>
    %c2_37 = arith.constant 2 : index
    %c2_38 = arith.constant 2 : index
    %60 = memref.load %arg2[%c2_37, %c2_38] : memref<3x4xf32, #tpu.memory_space<smem>>
    %61 = vector.broadcast %60 : f32 to vector<1x256xf32>
    %62 = arith.mulf %5, %61 : vector<1x256xf32>
    %63 = arith.addf %59, %62 : vector<1x256xf32>
    %c2_39 = arith.constant 2 : index
    %c3_40 = arith.constant 3 : index
    %64 = memref.load %arg2[%c2_39, %c3_40] : memref<3x4xf32, #tpu.memory_space<smem>>
    %65 = vector.broadcast %64 : f32 to vector<1x256xf32>
    %66 = arith.mulf %7, %65 : vector<1x256xf32>
    %67 = arith.addf %63, %66 : vector<1x256xf32>
    %c0_41 = arith.constant 0 : index
    %c2_42 = arith.constant 2 : index
    %c0_43 = arith.constant 0 : index
    %68 = vector.load %arg5[%c0_41, %c2_42, %c0_43] : memref<1x3x256xf32, #tpu.memory_space<vmem>>, vector<1x1x256xf32>
    %69 = vector.shape_cast %68 : vector<1x1x256xf32> to vector<1x256xf32>
    %70 = vector.shape_cast %67 : vector<1x256xf32> to vector<1x1x256xf32>
    tpu.vector_store %arg5[%c0_41, %c2_42, %c0_43], %70 {strides = array<i32>} : memref<1x3x256xf32, #tpu.memory_space<vmem>>, vector<1x1x256xf32>,
    return
  }
  func.func @transform_0(%arg0: i32, %arg1: i32) -> (i32, i32) {
    %c0_i32 = arith.constant 0 : i32
    %c0_i32_0 = arith.constant 0 : i32
    %c0_i32_1 = arith.constant 0 : i32
    return %c0_i32, %c0_i32_0 : i32, i32
  }
  func.func @transform_1(%arg0: i32, %arg1: i32) -> i32 {
    %c0_i32 = arith.constant 0 : i32
    %c0_i32_0 = arith.constant 0 : i32
    return %c0_i32 : i32
  }
  func.func @transform_2(%arg0: i32, %arg1: i32) -> (i32, i32, i32) {
    %c0_i32 = arith.constant 0 : i32
    %c0_i32_0 = arith.constant 0 : i32
    return %arg0, %c0_i32, %arg1 : i32, i32, i32
  }
  func.func @transform_3(%arg0: i32, %arg1: i32) -> (i32, i32, i32) {
    %c0_i32 = arith.constant 0 : i32
    %c0_i32_0 = arith.constant 0 : i32
    return %arg0, %c0_i32, %arg1 : i32, i32, i32
  }
}

</mosaic_0001>

<bundles_post_ra>
// kernel: tpu_custom_call.1
= control target key start
LH: loop header
LB: loop body
LE: loop exit
PB: predicated region body
PF: predicated region fallthrough
CT: control target
= control target key end

     0   :  { %8 = vsyncpa [#allocation4], 0  ;;  %s830_s0 = inlined_call_operand.hbm [shape: f32[3,4], index: 0, kind: input, shape index: {}]   ;;  %s831_s1 = inlined_call_operand.vmem [shape: f32[3], index: 1, kind: input, shape index: {}]   ;;  %s832_s2 = inlined_call_operand.hbm [shape: f32[2,4,256], index: 2, kind: input, shape index: {}]   ;;  %s833_s3 = inlined_call_operand.vmem [shape: f32[2,3,256], index: 3, kind: output, shape index: {}]  }
   0x1   :  { %9 = vsyncpa [#allocation5], 0 }
   0x2   :  { %10 = vsyncpa [#allocation3], 0 }
   0x3   :  { %12 = vsyncpa [#allocation3 + $0x1], 0  ;;  %s681_s12 = smov 0   ;;  %s683_s13 = smov 0  }
   0x4   :  { %s685_s14 = smov 0   ;;  %s687_s15 = smov 0  }
   0x5   :  { %s689_s16 = smov 0   ;;  %s691_s17 = smov 0  }
   0x6 LB: > { %s431_s18 = sadd.s32 4294967295, %s656_s17   ;;  %p94_p0 = scmp.ne.s32.totalorder %s640_s13, %s636_s12  ;;  %s656_s17 = sphi %s691_s17, %s18_s17   ;;  %s652_s16 = sphi %s689_s16, %s846_s16   ;;  %s648_s15 = sphi %s687_s15, %s845_s15   ;;  %s644_s14 = sphi %s685_s14, %s844_s14   ;;  %s640_s13 = sphi %s683_s13, %s843_s13   ;;  %s636_s12 = sphi %s681_s12, %s842_s12  }
   0x7   : > { %p711_p1 = scmp.eq.s32.totalorder %s431_s18, 0  ;;  %p433_p2 = scmp.ge.s32.totalorder %s656_s17, 1 }
   0x8   : > { %p133_p3 = scmp.lt.s32.totalorder %s656_s17, 3  ;;  %s155_s24 = sshll.u32 %s831_s1, 4  ;;  %s156_s24 = int_to_ptr.vmem [resolvable:$true] %s155_s24 }
   0x9   : > { %p719_p4 = por %p711_p1, %p94_p0  ;;  %s30_s26 = sadd.s32 1, %s652_s16 }
   0xa   : > { %p723_p5 = pnand %p433_p2, %p133_p3  ;;  %p739_p8 = scmp.ge.s32.totalorder %s30_s26, 2 }
   0xb   : > { %s658_s28 = smov [#allocation2]   ;;  %s555_s4 = scalar_lea.vmem %s156_s24, 16 }
   0xc   : > { %p478_p6 = pneg %p723_p5  ;;  %p556_p9 = scmp.ne.s32.totalorder %s156_s24, %s555_s4 }
   0xd   : > { %p563_p13 = scmp.lt.s32.totalorder %s156_s24, %s156_s24  ;;  %p564_p0 = scmp.lt.s32.totalorder %s555_s4, %s555_s4 }
   0xe   : > { %p734_p7 = pnand %p478_p6, %p711_p1 }
   0xf   : > { %p565_p2 = por %p564_p0, %p563_p13 }
  0x10   : > { %481 = dma.hbm_to_smem (!%p734_p7), %s830_s0, 64, %s658_s28, [#allocation4]  }
  0x11   : > { %p557_p10 = pneg %p734_p7 }
  0x13   : > { %p558_p11 = pnand %p557_p10, %p556_p9 }
  0x15   : > { %p559_p12 = pneg %p558_p11 }
  0x17   : > { %p566_p3 = pnand %p565_p2, %p559_p12 }
  0x19   : > { %569 = shalt.err (!%p566_p3)
}
  0x1a   : > { %s659_s5 = smov [#allocation6]   ;;  %s848_s26 = smov (%p739_p8, %s30_s26), 0 }
  0x1b   : > { %484 = dma.vmem_to_smem (!%p734_p7), %s156_s24, 16, %s659_s5, [#allocation5]  }
  0x1c   : > { %s81_s6 = sadd.s32 1, %s644_s14  ;;  %p88_p6 = scmp.ne.s32.totalorder %s644_s14, %s640_s13 }
  0x1d   : > { %s76_s7 = ssub.s32 %s652_s16, %s848_s26  ;;  %p89_p9 = scmp.eq.s32.totalorder %s656_s17, 0 }
  0x1e   : > { %p79_p10 = scmp.eq.s32.totalorder %s76_s7, 0  ;;  %p491_p11 = scmp.lt.s32.totalorder %s656_s17, 2 }
  0x1f   : > { %p90_p12 = por %p89_p9, %p88_p6  ;;  %s166_s8 = sand.u32 1, %s644_s14  }
  0x20   : > { %s765_s9 = scalar_select %p79_p10, %s644_s14, %s81_s6  }
  0x21   : > { %s437_s10 = sshll.u32 %s166_s8, 3  ;;  %s466_s11 = sshll.u32 %s652_s16, 7 }
  0x22   : > { %s178_s22 = scalar_lea.hbm %s832_s2, %s466_s11  ;;  %s170_s23 = scalar_lea.vmem [#allocation7], %s437_s10 }
  0x23   : > { %s180_s24 = sshll.u32 %s170_s23, 4  ;;  %p771_p7 = pnand %p491_p11, %p90_p12  ;;  %s181_s24 = int_to_ptr.vmem [resolvable:$true] %s180_s24 }
  0x24   : > { %s167_s27 = scalar_lea.sflag [#allocation3], %s166_s8  ;;  %s583_s28 = scalar_lea.vmem %s181_s24, 128 }
  0x25   : > { %p572_p8 = pneg %p771_p7  ;;  %p584_p13 = scmp.ne.s32.totalorder %s181_s24, %s583_s28 }
  0x26   : > { %s660_s29 = smov [#allocation7]  }
  0x27   : > { %p586_p0 = pnand %p584_p13, %p572_p8  ;;  %s588_s30 = sshll.u32 %s660_s29, 4  ;;  %s589_s30 = int_to_ptr.vmem [resolvable:$false] %s588_s30 }
  0x28   : > { %s590_s4 = scalar_lea.vmem %s589_s30, 256  ;;  %p591_p3 = scmp.lt.s32.totalorder %s181_s24, %s589_s30 }
  0x29   : > { %p587_p2 = pneg %p586_p0  ;;  %p592_p6 = scmp.lt.s32.totalorder %s590_s4, %s583_s28 }
  0x2b   : > { %p593_p9 = por %p592_p6, %p591_p3 }
  0x2d   : > { %p594_p10 = pnand %p593_p9, %p587_p2 }
  0x2f   : > { %597 = shalt.err (!%p594_p10)
}
  0x30   : > { %488 = dma.hbm_to_vmem [thread:$0]  (!%p771_p7), %s178_s22, 128, %s181_s24, %s167_s27  }
  0x31   : > { %189 = sbr.rel (%p723_p5) target bundleno = 91 (0x5b), region = 32 }
  0x36   : > { %623 = dma.done.wait (%p711_p1), [#allocation4], 64  }
  0x37   : > { %625 = vsyncadd (%p711_p1), [#allocation4], 4294967232 }
  0x38   : > { %627 = dma.done.wait (%p711_p1), [#allocation5], 16  }
  0x39   : > { %629 = vsyncadd (%p711_p1), [#allocation5], 4294967280  ;;  %s199_s5 = sand.u32 1, %s640_s13  }
  0x3a   : > { %s443_s6 = sshll.u32 %s199_s5, 3  ;;  %s200_s7 = scalar_lea.sflag [#allocation3], %s199_s5 }
  0x3b   : > { %s203_s8 = scalar_lea.vmem [#allocation7], %s443_s6 }
  0x3c   : > { %631 = dma.done.wait (%p719_p4), %s200_s7, 128  }
  0x3d   : > { %633 = vsyncadd (%p719_p4), %s200_s7, 4294967168 }
  0x3e   : > { %208 = sfence }
  0x3f   : > { %p233_p5 = scmp.lt.s32.totalorder %s648_s15, 1  ;;  %s249_s21 = sld [smem:[#allocation2]]  ;;  %v242_v0 = vld [vmem:[%s203_s8] ss:$4 sm:$0x3]  ;;  %v267_v13 = vlaneseq }
  0x40   : > { %s252_s19 = sld [smem:[#allocation6]]  ;;  %v446_v3 = vld [vmem:[%s203_s8 + $0x1] ss:$4 sm:$0x3] }
  0x41   : > { %s850_s15 = smov (!%p233_p5, %s648_s15), 1  ;;  %s449_s10 = sld [smem:[#allocation2 + $0x1]]  ;;  %v447_v4 = vld [vmem:[%s203_s8 + $0x2] ss:$4 sm:$0x3]  ;;  %vm802_vm0 = vcmp.lt.s32.totalorder %v267_v13, 256 }
  0x42   : > { %s450_s11 = sld [smem:[#allocation2 + $0x2]]  ;;  %v448_v6 = vld [vmem:[%s203_s8 + $0x3] ss:$4 sm:$0x3]  ;;  %s467_s27 = sshll.u32 %s850_s15, 3 }
  0x43   : > { %s451_s12 = sld [smem:[#allocation2 + $0x3]]  ;;  %s240_s6 = scalar_lea.vmem %s833_s3, %s467_s27 }
  0x44   : > { %s452_s18 = sld [smem:[#allocation2 + $0x80]] }
  0x45   : > { %v250_v1 = vstv %s249_s21  ;;  %s453_s22 = sld [smem:[#allocation6 + $0x1]] }
  0x46   : > { %v251_v2 = vmul.f32 %v250_v1, %v242_v0  ;;  %v253_v5 = vstv %s252_s19  ;;  %s454_s20 = sld [smem:[#allocation2 + $0x81]] }
  0x47   : > { %v256_v8 = vstv %s449_s10  ;;  %s455_s23 = sld [smem:[#allocation2 + $0x82]] }
  0x48   : > { %v254_v7 = vadd.f32 %v253_v5, %v251_v2  ;;  %v257_v9 = vmul.f32 %v446_v3, %v256_v8  ;;  %v260_v10 = vstv %s450_s11  ;;  %s456_s24 = sld [smem:[#allocation2 + $0x83]] }
  0x49   : > { %v261_v11 = vmul.f32 %v447_v4, %v260_v10  ;;  %v264_v12 = vstv %s451_s12  ;;  %s458_s25 = sld [smem:[#allocation2 + $0x100]] }
  0x4a   : > { %v258_v14 = vadd.f32 %v257_v9, %v254_v7  ;;  %v265_v15 = vmul.f32 %v448_v6, %v264_v12  ;;  %v273_v16 = vstv %s452_s18  ;;  %s459_s28 = sld [smem:[#allocation6 + $0x2]] }
  0x4b   : > { %v274_v17 = vmul.f32 %v273_v16, %v242_v0  ;;  %v276_v18 = vstv %s453_s22  ;;  %s460_s29 = sld [smem:[#allocation2 + $0x101]] }
  0x4c   : > { %v262_v19 = vadd.f32 %v261_v11, %v258_v14  ;;  %v279_v20 = vstv %s454_s20  ;;  %s461_s30 = sld [smem:[#allocation2 + $0x102]] }
  0x4d   : > { %v277_v22 = vadd.f32 %v276_v18, %v274_v17  ;;  %v280_v23 = vmul.f32 %v446_v3, %v279_v20  ;;  %v283_v24 = vstv %s455_s23  ;;  %s462_s15 = sld [smem:[#allocation2 + $0x103]] }
  0x4e   : > { %v266_v25 = vadd.f32 %v265_v15, %v262_v19  ;;  %v284_v26 = vmul.f32 %v447_v4, %v283_v24  ;;  %v287_v27 = vstv %s456_s24 }
  0x4f   : > { %v281_v28 = vadd.f32 %v280_v23, %v277_v22  ;;  %v288_v29 = vmul.f32 %v448_v6, %v287_v27  ;;  %v293_v30 = vstv %s458_s25 }
  0x50   : > { %271 = vst.msk [vmem:[%s240_s6] ss:$4 sm:$0x3] %vm802_vm0, %v266_v25  ;;  %v294_v31 = vmul.f32 %v293_v30, %v242_v0  ;;  %v296_v32 = vstv %s459_s28 }
  0x51   : > { %v285_v33 = vadd.f32 %v284_v26, %v281_v28  ;;  %v299_v34 = vstv %s460_s29 }
  0x52   : > { %v297_v35 = vadd.f32 %v296_v32, %v294_v31  ;;  %v300_v36 = vmul.f32 %v446_v3, %v299_v34  ;;  %v303_v37 = vstv %s461_s30 }
  0x53   : > { %v289_v38 = vadd.f32 %v288_v29, %v285_v33  ;;  %v304_v39 = vmul.f32 %v447_v4, %v303_v37  ;;  %v307_v40 = vstv %s462_s15 }
  0x54   : > { %v301_v41 = vadd.f32 %v300_v36, %v297_v35  ;;  %v308_v42 = vmul.f32 %v448_v6, %v307_v40 }
  0x55   : > { %457 = vst.msk [vmem:[%s240_s6 + $0x1] ss:$4 sm:$0x3] %vm802_vm0, %v289_v38 }
  0x56   : > { %v305_v43 = vadd.f32 %v304_v39, %v301_v41 }
  0x58   : > { %v309_v44 = vadd.f32 %v308_v42, %v305_v43 }
  0x5a   : > { %463 = vst.msk [vmem:[%s240_s6 + $0x2] ss:$4 sm:$0x3] %vm802_vm0, %v309_v44 }
  0x5b PF: > { %s18_s17 = sadd.s32 1, %s656_s17   ;;  %s842_s12 = smov %s640_s13 }
  0x5c   : > { %p15_p1 = scmp.ge.s32.totalorder %s18_s17, 4   ;;  %s843_s13 = smov %s644_s14 }
  0x5d   : > { %s844_s14 = smov %s765_s9  ;;  %s845_s15 = smov %s652_s16 }
  0x5e   : > { %s846_s16 = smov %s848_s26  ;;  %17 = sbr.rel (!%p15_p1) target bundleno = 6 (0x6), region = 87 }
  0x63   :  { %342 = vsyncpa [#allocation3], 1 }
  0x64   :  { %344 = vsyncpa [#allocation3 + $0x1], 1 }
  0x65   :  { %345 = vsyncpa [#allocation4], 1 }
  0x66   :  { %347 = vsyncpa [#allocation4 + $0x1], 1 }
  0x67   :  { %348 = vsyncpa [#allocation5], 1 }
  0x68   :  { %350 = vsyncpa [#allocation5 + $0x1], 1 }

</bundles_post_ra>
